<compile_context>
chip_gen: v7x
topology: tpu7x:2x2x1
jax: 0.10.0
libtpu: 0.0.40
codegen_flags: <defaults>
</compile_context>

<pallas_src>
import functools

import jax
import jax.numpy as jnp
import numpy as np
from jax.experimental import pallas as pl
from jax.experimental.pallas import tpu as pltpu


MXU_BF16 = True   # bf16 operands for the layer-2/3 matmuls (f32 accumulation)


# ----------------------------------------------------------------------------
# One-off probe to pin pltpu.roll's rotation direction.  Executed eagerly at
# module import (never under a jit trace).
# ----------------------------------------------------------------------------
def _probe_roll_like_numpy() -> bool:
    def probe_kernel(x_ref, o_ref):
        o_ref[...] = pltpu.roll(x_ref[...], shift=1, axis=1)

    x = jnp.arange(8 * 128, dtype=jnp.float32).reshape(8, 128)
    y = pl.pallas_call(
        probe_kernel,
        out_shape=jax.ShapeDtypeStruct((8, 128), jnp.float32),
    )(x)
    # np.roll semantics: out[i] = in[i - shift]  ->  y[0, 1] == x[0, 0] == 0
    return bool(np.asarray(y)[0, 1] == 0.0)


_ROLL_LIKE_NUMPY = _probe_roll_like_numpy()


# ----------------------------------------------------------------------------
# Fused whole-network kernel.  Activation layout: (channels, HWp), flattened
# spatial axis on lanes.  One program per batch element (grid=(N,), parallel).
# ----------------------------------------------------------------------------
def net2_2_kernel(x_ref, w1_ref, b1_ref, w2_ref, b2_ref, w3_ref, b3_ref,
                  out_ref, *, H, W, HWp, roll_like_numpy):
    x = x_ref[0]                                       # (cin_pad, HWp) f32

    # ---- tap geometry: offsets + boundary masks, computed exactly once -----
    pos = jax.lax.broadcasted_iota(jnp.int32, (1, HWp), 1)
    px = pos % W
    py = pos // W
    taps = []                                          # [(offset, mask|None)]
    for ky in range(3):
        dy = ky - 1
        for kx in range(3):
            dx = kx - 1
            if dy == 0 and dx == 0:
                taps.append((0, None))                 # center tap: no roll/mask
            else:
                valid = ((px + dx >= 0) & (px + dx < W) &
                         (py + dy >= 0) & (py + dy < H))
                taps.append((dy * W + dx, valid))

    def shift_mask(a, off, mask):
        # out[:, p] = a[:, p + off] where tap (dy,dx) is in-bounds at p, else 0.
        # (Circular wrap only ever hits masked / padded columns.)
        if off != 0:
            s = (-off) % HWp if roll_like_numpy else off % HWp
            a = pltpu.roll(a, shift=s, axis=1)
        if mask is not None:
            a = jnp.where(mask, a, 0.0)
        return a

    # ---- layer 1: INPUT-side shift (Cin_pad=8 << Cout=144) -----------------
    # 9 accumulating matmuls; no im2col slab is materialized.
    acc1 = None
    for t, (off, mask) in enumerate(taps):
        u = jnp.dot(w1_ref[t], shift_mask(x, off, mask),
                    preferred_element_type=jnp.float32)
        acc1 = u if acc1 is None else acc1 + u
    a1 = jnp.maximum(acc1 + b1_ref[...], 0.0)          # (144, HWp) f32
    a1_m = a1.astype(w2_ref.dtype)                     # bf16 MXU operand

    # ---- layer 2: OUTPUT-side shift (Cout=40 << Cin=144) -------------------
    # rows: [0:16] thetaphi hidden, [16:32] losn hidden,
    #       [32] poweratio, [33] power, [34] delay, [35:40] zero pad
    acc2 = None
    for t, (off, mask) in enumerate(taps):
        u = jnp.dot(w2_ref[t], a1_m, preferred_element_type=jnp.float32)
        u = shift_mask(u, off, mask)
        acc2 = u if acc2 is None else acc2 + u
    a2 = acc2 + b2_ref[...]                            # (40, HWp) f32

    # ---- layer 3: thetaphi + losn heads, OUTPUT-side shift (Cout=8 << 32) ---
    h = jnp.maximum(a2[0:32], 0.0).astype(w3_ref.dtype)
    acc3 = None
    for t, (off, mask) in enumerate(taps):
        v = jnp.dot(w3_ref[t], h, preferred_element_type=jnp.float32)
        v = shift_mask(v, off, mask)
        acc3 = v if acc3 is None else acc3 + v
    a3 = acc3 + b3_ref[...]                            # (8, HWp): [0:2] thephi, [2:5] losn

    # -log(softmax) over the 3 losn logits (sublane axis)
    z = a3[2:5]
    m = jnp.max(z, axis=0, keepdims=True)
    lse = jnp.log(jnp.sum(jnp.exp(z - m), axis=0, keepdims=True)) + m
    los = lse - z                                      # (3, HWp), >= 0

    # epilogue: lane-dense stores, output channel order
    #   [0:2]=thephi, [2]=poweratio, [3]=power, [4]=delay, [5:8]=los
    out_ref[0, 0:2] = a3[0:2]
    out_ref[0, 2:5] = a2[32:35]
    out_ref[0, 5:8] = los


# ----------------------------------------------------------------------------
# Wrapper: NCHW in, NCHW out.  One pallas_call for the entire forward.
# ----------------------------------------------------------------------------
def net2_2_forward(packed, x_nchw):
    w1, b1, w2, b2, w3, b3 = packed
    N, cin, H, W = x_nchw.shape
    HW = H * W
    HWp = ((HW + 127) // 128) * 128        # keep rolls/stores lane-dense
    cin_pad = w1.shape[2]

    x = x_nchw.reshape(N, cin, HW)
    if cin_pad > cin or HWp > HW:
        x = jnp.pad(x, ((0, 0), (0, cin_pad - cin), (0, HWp - HW)))

    kernel = functools.partial(net2_2_kernel, H=H, W=W, HWp=HWp,
                               roll_like_numpy=_ROLL_LIKE_NUMPY)

    out = pl.pallas_call(
        kernel,
        out_shape=jax.ShapeDtypeStruct((N, 8, HWp), jnp.float32),
        grid=(N,),
        in_specs=[
            pl.BlockSpec((1, cin_pad, HWp), lambda n: (n, 0, 0)),
            pl.BlockSpec(w1.shape, lambda n: (0, 0, 0)),
            pl.BlockSpec(b1.shape, lambda n: (0, 0)),
            pl.BlockSpec(w2.shape, lambda n: (0, 0, 0)),
            pl.BlockSpec(b2.shape, lambda n: (0, 0)),
            pl.BlockSpec(w3.shape, lambda n: (0, 0, 0)),
            pl.BlockSpec(b3.shape, lambda n: (0, 0)),
        ],
        out_specs=pl.BlockSpec((1, 8, HWp), lambda n: (n, 0, 0)),
        compiler_params=pltpu.CompilerParams(
            dimension_semantics=("parallel",)),
    )(x, w1, b1, w2, b2, w3, b3)

    out = out[:, :, :HW]
    thephi = out[:, 0:2].reshape(N, 2, H, W)
    poweratio = out[:, 2:3].reshape(N, 1, H, W)
    power = out[:, 3:4].reshape(N, 1, H, W)
    delay = out[:, 4:5].reshape(N, 1, H, W)
    los = out[:, 5:8].reshape(N, 3, H, W)
    return thephi, poweratio, power, delay, los


# ----------------------------------------------------------------------------
# Parameter init (PyTorch Conv2d default: U(-k, k), k = 1/sqrt(fan_in)),
# stored per-branch in canonical (Cout, Cin, 3, 3) layout.
# ----------------------------------------------------------------------------
def init_conv_params(key, cin, cout):
    kw, kb = jax.random.split(key)
    bound = 1.0 / float(np.sqrt(cin * 9))
    w = jax.random.uniform(kw, (cout, cin, 3, 3), jnp.float32, -bound, bound)
    b = jax.random.uniform(kb, (cout,), jnp.float32, -bound, bound)
    return w, b


def init_net2_2_params(key, in_channels):
    k = jax.random.split(key, 12)
    return {
        "power":     [init_conv_params(k[0], in_channels, 16),
                      init_conv_params(k[1], 16, 1)],
        "thetaphi":  [init_conv_params(k[2], in_channels, 64),
                      init_conv_params(k[3], 64, 16),
                      init_conv_params(k[4], 16, 2)],
        "poweratio": [init_conv_params(k[5], in_channels, 16),
                      init_conv_params(k[6], 16, 1)],
        "losn":      [init_conv_params(k[7], in_channels, 32),
                      init_conv_params(k[8], 32, 16),
                      init_conv_params(k[9], 16, 3)],
        "delay":     [init_conv_params(k[10], in_channels, 16),
                      init_conv_params(k[11], 16, 1)],
    }


# ----------------------------------------------------------------------------
# Weight packing: one dense (Cout_total, Cin_total) matmul weight per tap.
# ----------------------------------------------------------------------------
def _pack_per_tap(weights, out_offsets, in_offsets, out_total, in_total, dtype):
    w9 = np.zeros((9, out_total, in_total), np.float32)
    for w, ro, co in zip(weights, out_offsets, in_offsets):
        w = np.asarray(w, np.float32)                  # (Cout, Cin, 3, 3)
        cout, cin = w.shape[0], w.shape[1]
        for ky in range(3):
            for kx in range(3):
                w9[ky * 3 + kx, ro:ro + cout, co:co + cin] = w[:, :, ky, kx]
    return jnp.asarray(w9, dtype)


def _pack_bias(biases, offsets, total):
    b = np.zeros((total, 1), np.float32)
    for bb, ro in zip(biases, offsets):
        bb = np.asarray(bb, np.float32)
        b[ro:ro + bb.shape[0], 0] = bb
    return jnp.asarray(b)


def pack_net2_2_params(params, in_channels):
    mxu_dtype = jnp.bfloat16 if MXU_BF16 else jnp.float32
    cin_pad = max(8, ((in_channels + 7) // 8) * 8)

    # layer 1: concat order defines the 144-channel a1 layout
    order1 = ["power", "thetaphi", "poweratio", "losn", "delay"]
    l1_off, o = {}, 0
    for b in order1:
        l1_off[b] = o
        o += int(params[b][0][0].shape[0])
    c1 = o                                             # 144
    w1 = _pack_per_tap([params[b][0][0] for b in order1],
                       [l1_off[b] for b in order1], [0] * 5,
                       c1, cin_pad, jnp.float32)       # layer 1 stays f32 (K=8)
    b1 = _pack_bias([params[b][0][1] for b in order1],
                    [l1_off[b] for b in order1], c1)

    # layer 2 rows: thetaphi hidden 0:16, losn hidden 16:32,
    #               poweratio 32, power 33, delay 34 (matches output order)
    order2 = ["thetaphi", "losn", "poweratio", "power", "delay"]
    row2 = [0, 16, 32, 33, 34]
    w2 = _pack_per_tap([params[b][1][0] for b in order2], row2,
                       [l1_off[b] for b in order2], 40, c1, mxu_dtype)
    b2 = _pack_bias([params[b][1][1] for b in order2], row2, 40)

    # layer 3: reads rows [0:16] (thetaphi) / [16:32] (losn) of relu(a2[:32])
    w3 = _pack_per_tap([params["thetaphi"][2][0], params["losn"][2][0]],
                       [0, 2], [0, 16], 8, 32, mxu_dtype)
    b3 = _pack_bias([params["thetaphi"][2][1], params["losn"][2][1]], [0, 2], 8)
    return (w1, b1, w2, b2, w3, b3)


# ----------------------------------------------------------------------------
# Pure-JAX reference of the PyTorch module (validation only).
# ----------------------------------------------------------------------------
def _conv_ref(x, w, b):
    y = jax.lax.conv_general_dilated(
        x, w, window_strides=(1, 1), padding=((1, 1), (1, 1)),
        dimension_numbers=("NCHW", "OIHW", "NCHW"),
        precision=jax.lax.Precision.HIGHEST)
    return y + b.reshape(1, -1, 1, 1)


def net2_2_reference(params, x):
    def seq(name):
        h = x
        layers = params[name]
        for i, (w, b) in enumerate(layers):
            h = _conv_ref(h, w, b)
            if i < len(layers) - 1:
                h = jax.nn.relu(h)
        return h

    thephi = seq("thetaphi")
    poweratio = seq("poweratio")
    power = seq("power")
    delay = seq("delay")
    los = -jax.nn.log_softmax(seq("losn"), axis=1)
    return thephi, poweratio, power, delay, los


if __name__ == "__main__":
    key = jax.random.PRNGKey(0)
    k_param, k_x = jax.random.split(key)

    N, C, H, W = 2, 4, 16, 16
    x = jax.random.normal(k_x, (N, C, H, W), jnp.float32)

    params = init_net2_2_params(k_param, C)
    packed = pack_net2_2_params(params, C)

    fwd = jax.jit(net2_2_forward)
    outs = jax.block_until_ready(fwd(packed, x))

    thephi, poweratio, power, delay, los = outs
    assert thephi.shape == (N, 2, H, W)
    assert poweratio.shape == (N, 1, H, W)
    assert power.shape == (N, 1, H, W)
    assert delay.shape == (N, 1, H, W)
    assert los.shape == (N, 3, H, W)
    assert bool(jnp.all(los >= -1e-5))     # -log(softmax) is non-negative

    # validate against the pure-JAX reference of the PyTorch module
    refs = jax.block_until_ready(jax.jit(net2_2_reference)(params, x))
    tol = 3e-2 if MXU_BF16 else 2e-3       # bf16 MXU operands vs f32 reference
    for got, want in zip(outs, refs):
        np.testing.assert_allclose(np.asarray(got), np.asarray(want),
                                   rtol=tol, atol=tol)

    print("KERNEL_OK")
</pallas_src>

<mosaic_0001>
module attributes {stable_mosaic.version = 11 : i64} {
  func.func @probe_kernel(%arg0: memref<8x128xf32, #tpu.memory_space<vmem>>, %arg1: memref<8x128xf32, #tpu.memory_space<vmem>>) attributes {dimension_semantics = [], scalar_prefetch = 0 : i64, scratch_operands = 0 : i64, tpu.core_type = #tpu.core_type<tc>} {
    %c0 = arith.constant 0 : index
    %c0_0 = arith.constant 0 : index
    %0 = vector.load %arg0[%c0, %c0_0] : memref<8x128xf32, #tpu.memory_space<vmem>>, vector<8x128xf32>
    %c1_i32 = arith.constant 1 : i32
    %1 = tpu.dynamic_rotate %0 by %c1_i32 dim 1 : vector<8x128xf32>, i32 -> vector<8x128xf32>
    %c0_1 = arith.constant 0 : index
    %c0_2 = arith.constant 0 : index
    %2 = vector.load %arg1[%c0_1, %c0_2] : memref<8x128xf32, #tpu.memory_space<vmem>>, vector<8x128xf32>
    tpu.vector_store %arg1[%c0_1, %c0_2], %1 {strides = array<i32>} : memref<8x128xf32, #tpu.memory_space<vmem>>, vector<8x128xf32>,
    return
  }
}

</mosaic_0001>

<bundles_post_ra>
// kernel: tpu_custom_call.1
= control target key start
LH: loop header
LB: loop body
LE: loop exit
PB: predicated region body
PF: predicated region fallthrough
CT: control target
= control target key end

     0   :  { %6 = vsyncpa [#allocation3], 0  ;;  %s128_s0 = inlined_call_operand.hbm [shape: f32[8,128], index: 0, kind: input, shape index: {}]   ;;  %s129_s1 = inlined_call_operand.hbm [shape: f32[8,128], index: 1, kind: output, shape index: {}]  }
   0x1   :  { %7 = vsyncpa [#allocation4], 0  ;;  %s91_s6 = smov [#allocation2]   ;;  %s43_s10 = scalar_lea.hbm %s128_s0, 128 }
   0x2   :  { %s14_s7 = sshll.u32 %s91_s6, 4  ;;  %p44_p0 = scmp.ne.s32.totalorder %s128_s0, %s43_s10  ;;  %s15_s7 = int_to_ptr.vmem [resolvable:$true] %s14_s7 }
   0x3   :  { %p47_p1 = scmp.lt.u32.totalorder %s43_s10, %s128_s0 }
   0x5   :  { %p49_p2 = pnand %p47_p1, %p44_p0 }
   0x7   :  { %52 = shalt.err (!%p49_p2)
}
   0x8   :  { %s53_s15 = scalar_lea.vmem %s15_s7, 128  ;;  %p58_p4 = scmp.lt.s32.totalorder %s15_s7, %s15_s7 }
   0x9   :  { %p54_p3 = scmp.ne.s32.totalorder %s15_s7, %s53_s15  ;;  %p59_p5 = scmp.lt.s32.totalorder %s53_s15, %s53_s15 }
   0xb   :  { %p60_p6 = por %p59_p5, %p58_p4 }
   0xd   :  { %p61_p7 = pnand %p60_p6, %p54_p3 }
   0xf   :  { %64 = shalt.err (!%p61_p7)
}
  0x10   :  { %17 = dma.hbm_to_vmem [thread:$0]  %s128_s0, 128, %s15_s7, [#allocation3]  }
  0x11   :  { %87 = dma.done.wait [#allocation3], 128  }
  0x12   :  { %88 = vsyncadd [#allocation3], 4294967168  ;;  %v21_v0 = vld [vmem:[#allocation2] sm:$0xff]  ;;  %s92_s18 = smov 1   ;;  %s93_s19 = smov [#allocation5]  }
  0x13   :  { %22 = vrot.lane.b32.xlu0 %v21_v0, %s92_s18  ;;  %s31_s20 = sshll.u32 %s93_s19, 4  ;;  %s32_s20 = int_to_ptr.vmem [resolvable:$true] %s31_s20 }
  0x14   :  { %s65_s21 = scalar_lea.vmem %s32_s20, 128  ;;  %p70_p9 = scmp.lt.s32.totalorder %s32_s20, %s32_s20 }
  0x15   :  { %p66_p8 = scmp.ne.s32.totalorder %s32_s20, %s65_s21  ;;  %p71_p10 = scmp.lt.s32.totalorder %s65_s21, %s65_s21 }
  0x17   :  { %p72_p11 = por %p71_p10, %p70_p9 }
  0x19   :  { %p73_p12 = pnand %p72_p11, %p66_p8 }
  0x85   :  { %v23_v1 = vpop.permute.xlu0 %22 }
  0x86   :  { %24 = vst [vmem:[#allocation5] sm:$0xff] %v23_v1 }
  0x87   :  { %76 = shalt.err (!%p73_p12)
}
  0x88   :  { %s77_s0 = scalar_lea.hbm %s129_s1, 128 }
  0x89   :  { %p78_p13 = scmp.ne.s32.totalorder %s129_s1, %s77_s0  ;;  %p81_p0 = scmp.lt.u32.totalorder %s77_s0, %s129_s1 }
  0x8b   :  { %p83_p1 = pnand %p81_p0, %p78_p13 }
  0x8d   :  { %86 = shalt.err (!%p83_p1)
}
  0x8e   :  { %34 = dma.vmem_to_hbm [thread:$0]  %s32_s20, 128, %s129_s1, [#allocation4]  }
  0x8f   :  { %89 = dma.done.wait [#allocation4], 128  }
  0x90   :  { %90 = vsyncadd [#allocation4], 4294967168 }
  0x91   :  { %38 = vsyncpa [#allocation3], 1 }
  0x92   :  { %39 = vsyncpa [#allocation4], 1 }

</bundles_post_ra>
